<compile_context>
chip_gen: v6e
topology: v6e:2x2x1
jax: 0.10.0
libtpu: 0.0.40
codegen_flags: <defaults>
</compile_context>

<pallas_src>
import functools

import jax
import jax.numpy as jnp
from jax import lax
from jax.experimental import pallas as pl
from jax.experimental.pallas import tpu as pltpu


# ---------------------------------------------------------------------------
# Tiled linear (y = x @ w (+ b)), weights already in (in, out) layout.
# ---------------------------------------------------------------------------
def _matmul_kernel(x_ref, w_ref, o_ref, acc_ref):
    @pl.when(pl.program_id(2) == 0)
    def _():
        acc_ref[...] = jnp.zeros_like(acc_ref)

    acc_ref[...] += jnp.dot(x_ref[...], w_ref[...], preferred_element_type=jnp.float32)

    @pl.when(pl.program_id(2) == pl.num_programs(2) - 1)
    def _():
        o_ref[...] = acc_ref[...].astype(o_ref.dtype)


def _matmul_bias_kernel(x_ref, w_ref, b_ref, o_ref, acc_ref):
    @pl.when(pl.program_id(2) == 0)
    def _():
        acc_ref[...] = jnp.zeros_like(acc_ref)

    acc_ref[...] += jnp.dot(x_ref[...], w_ref[...], preferred_element_type=jnp.float32)

    @pl.when(pl.program_id(2) == pl.num_programs(2) - 1)
    def _():
        o_ref[...] = (acc_ref[...] + b_ref[...]).astype(o_ref.dtype)


def _round_up(x, m):
    return (x + m - 1) // m * m


def _pick_tile_rows(m):
    """Sublane axis: largest multiple-of-8 tile that divides m (m is pre-padded)."""
    for t in (512, 256, 128, 64, 32, 16, 8):
        if m % t == 0:
            return t
    return m


def _pick_tile_lanes(d):
    """Lane axis: largest multiple-of-128 tile that divides d; ragged (small) dims
    fall back to a single full-extent block."""
    for t in (512, 384, 256, 128):
        if d % t == 0:
            return t
    return d


def _pallas_linear(x2d, w, bias=None):
    """y = x2d @ w (+ bias). w is (K, N); bias is (N,)."""
    M, K = x2d.shape
    K2, N = w.shape
    assert K == K2, (K, K2)

    Mp = _round_up(M, 8)
    if Mp != M:  # pad rows so the sublane tile constraint always holds
        x2d = jnp.pad(x2d, ((0, Mp - M), (0, 0)))

    tm = _pick_tile_rows(Mp)
    tn = _pick_tile_lanes(N)
    tk = _pick_tile_lanes(K)
    grid = (Mp // tm, N // tn, K // tk)

    in_specs = [
        pl.BlockSpec((tm, tk), lambda i, j, k: (i, k)),
        pl.BlockSpec((tk, tn), lambda i, j, k: (k, j)),
    ]
    if bias is None:
        kern = _matmul_kernel
        args = (x2d, w)
    else:
        kern = _matmul_bias_kernel
        in_specs.append(pl.BlockSpec((1, tn), lambda i, j, k: (0, j)))
        args = (x2d, w, bias.reshape(1, N))

    out = pl.pallas_call(
        kern,
        out_shape=jax.ShapeDtypeStruct((Mp, N), x2d.dtype),
        grid_spec=pltpu.PrefetchScalarGridSpec(
            num_scalar_prefetch=0,
            grid=grid,
            in_specs=in_specs,
            out_specs=pl.BlockSpec((tm, tn), lambda i, j, k: (i, j)),
            scratch_shapes=[pltpu.VMEM((tm, tn), jnp.float32)],
        ),
        compiler_params=pltpu.CompilerParams(
            dimension_semantics=("parallel", "parallel", "arbitrary")
        ),
    )(*args)
    return out[:M] if Mp != M else out


# ---------------------------------------------------------------------------
# kNN attention kernel.
#   grid = (batch, query_tiles), both parallel.
#   q block: (1, heads, tq, dim_head) bf16 (scale pre-folded)
#   k,v blocks: (1, heads, n, dim_head) bf16 (resident across the query-tile axis)
#   out block: (1, tq, heads*dim_head) in 'b n (h d)' layout, stored lane-dense once.
# ---------------------------------------------------------------------------
def _knn_attention_kernel(q_ref, k_ref, v_ref, o_ref, acc_ref, *,
                          heads, dim_head, k_keep, n_iters):
    n = k_ref.shape[2]
    # Hoisted constant (JAX does not CSE broadcast_in_dim; build once per step).
    ones_cnt = jnp.ones((n, 128), dtype=jnp.bfloat16)

    # Static unroll over heads (small, typically 4-8). Per-head temporaries die at
    # the scratch store, so cross-iteration register pressure stays bounded.
    for h in range(heads):
        q = q_ref[0, h]          # (tq, Dh) bf16, dim_head^-0.5 already folded in
        k = k_ref[0, h]          # (n,  Dh) bf16
        v = v_ref[0, h]          # (n,  Dh) bf16

        # q @ k^T: bf16 inputs, f32 accumulation, no explicit transpose.
        dots = lax.dot_general(
            q, k, (((1,), (1,)), ((), ())), preferred_element_type=jnp.float32
        )                         # (tq, n) f32

        if k_keep < n:
            # Binary-search the k-th largest score per row (threshold). The per-row
            # count runs on the MXU (bf16 mask @ ones) so the XLU stays off the
            # critical path of this loop. Ties at the threshold are kept (differs
            # from torch.topk only on near-ties within (max-min)*2^-n_iters).
            lo = jnp.min(dots, axis=-1, keepdims=True)
            hi = jnp.max(dots, axis=-1, keepdims=True)

            def body(_, carry):
                lo_, hi_ = carry
                mid = 0.5 * (lo_ + hi_)
                ge = (dots >= mid).astype(jnp.bfloat16)               # (tq, n)
                cnt = lax.dot_general(
                    ge, ones_cnt, (((1,), (0,)), ((), ())),
                    preferred_element_type=jnp.float32)[:, :1]        # (tq, 1)
                keep = cnt >= k_keep
                return jnp.where(keep, mid, lo_), jnp.where(keep, hi_, mid)

            lo, _ = lax.fori_loop(0, n_iters, body, (lo, hi))
            # One final NxN compare (cheap vs. n_iters of them inside the loop).
            dots = jnp.where(dots >= lo, dots, -jnp.inf)

        # Softmax (f32); normalize AFTER the PV matmul (NxDh multiply, not NxN).
        m = jnp.max(dots, axis=-1, keepdims=True)
        p = jnp.exp(dots - m)                                          # (tq, n) f32
        l = jnp.sum(p, axis=-1, keepdims=True)                         # (tq, 1)
        pv = lax.dot_general(
            p.astype(jnp.bfloat16), v, (((1,), (0,)), ((), ())),
            preferred_element_type=jnp.float32)                        # (tq, Dh) f32

        c0 = h * dim_head
        acc_ref[:, c0:c0 + dim_head] = pv * (1.0 / l)

    # Single lane-dense store of all heads in 'b n (h d)' layout.
    o_ref[0, :, :] = acc_ref[...].astype(o_ref.dtype)


def _pick_tq(n):
    for t in (256, 128, 64, 32, 16, 8):
        if n % t == 0:
            return t
    return n  # ragged n: one full-extent query block


# ---------------------------------------------------------------------------
# Forward pass
# ---------------------------------------------------------------------------
def attention_forward(x, params, *, heads, dim_head, knn_attention=0.7,
                      bisect_iters=16):
    """params weights are stored pre-transposed to (in_features, out_features);
    a PyTorch state dict (out, in) should be transposed once at load time."""
    b, n, dim = x.shape
    inner = heads * dim_head
    scale = dim_head ** (-0.5)

    # to_qkv: Linear(dim, 3*inner, bias=False)
    qkv = _pallas_linear(x.reshape(b * n, dim), params["w_qkv"])       # (b*n, 3*inner)

    # One amortized HBM transpose to head-major layout + bf16 cast for the MXU.
    # Scale is folded into q here (outside the kernel), removing the NxN multiply.
    qkv = qkv.reshape(b, n, 3, heads, dim_head).transpose(2, 0, 3, 1, 4)
    q = (qkv[0] * scale).astype(jnp.bfloat16)                          # (b,h,n,Dh)
    k = qkv[1].astype(jnp.bfloat16)
    v = qkv[2].astype(jnp.bfloat16)

    use_knn = bool(knn_attention)
    k_keep = max(1, int(n * knn_attention)) if use_knn else n          # NaN-guarded

    tq = _pick_tq(n)
    n_q = n // tq

    kern = functools.partial(
        _knn_attention_kernel,
        heads=heads, dim_head=dim_head, k_keep=k_keep, n_iters=bisect_iters,
    )

    # VMEM budget: double-buffered blocks + scratch + per-head intermediates.
    itemsz = x.dtype.itemsize
    blk = 2 * (heads * tq * dim_head * 2          # q (bf16)
               + 2 * heads * n * dim_head * 2     # k, v (bf16)
               + tq * inner * itemsz)             # out
    interm = 6 * tq * n * 4 + tq * inner * 4      # dots/p/mask headroom + scratch
    vmem_limit = int(min(56 << 20, blk + interm + (16 << 20)))

    cost = pl.CostEstimate(
        flops=int(2 * b * heads * n * n * (2 * dim_head + bisect_iters)),
        transcendentals=int(b * heads * n * n),
        bytes_accessed=int(3 * b * n * inner * 2 + b * n * inner * itemsz),
    )

    out = pl.pallas_call(
        kern,
        out_shape=jax.ShapeDtypeStruct((b, n, inner), x.dtype),
        grid_spec=pltpu.PrefetchScalarGridSpec(
            num_scalar_prefetch=0,
            grid=(b, n_q),
            in_specs=[
                pl.BlockSpec((1, heads, tq, dim_head), lambda i, qi: (i, 0, qi, 0)),
                pl.BlockSpec((1, heads, n, dim_head), lambda i, qi: (i, 0, 0, 0)),
                pl.BlockSpec((1, heads, n, dim_head), lambda i, qi: (i, 0, 0, 0)),
            ],
            out_specs=pl.BlockSpec((1, tq, inner), lambda i, qi: (i, qi, 0)),
            scratch_shapes=[pltpu.VMEM((tq, inner), jnp.float32)],
        ),
        compiler_params=pltpu.CompilerParams(
            dimension_semantics=("parallel", "parallel"),
            vmem_limit_bytes=vmem_limit,
        ),
        cost_estimate=cost,
    )(q, k, v)

    # Output already in 'b n (h d)' layout -> to_out: Linear(inner, dim)
    # (Dropout(0.0) is identity at inference.)
    project_out = not (heads == 1 and dim_head == dim)
    if project_out:
        out2d = _pallas_linear(out.reshape(b * n, inner), params["w_out"], params["b_out"])
        return out2d.reshape(b, n, dim)
    return out
    # TODO(synk): apply_transform branch (Conv2d(heads,heads,1) + BatchNorm2d
    # re-attention) not implemented; module default is apply_transform=False.


# ---------------------------------------------------------------------------
if __name__ == "__main__":
    key = jax.random.PRNGKey(0)
    B, N, DIM = 2, 8, 32
    HEADS, DIM_HEAD = 4, 16
    INNER = HEADS * DIM_HEAD

    kx, kw1, kw2, kb = jax.random.split(key, 4)
    x = jax.random.normal(kx, (B, N, DIM), dtype=jnp.float32)
    params = {
        # stored (in_features, out_features); transpose PyTorch weights once at load
        "w_qkv": 0.02 * jax.random.normal(kw1, (DIM, 3 * INNER), dtype=jnp.float32),
        "w_out": 0.02 * jax.random.normal(kw2, (INNER, DIM), dtype=jnp.float32),
        "b_out": 0.02 * jax.random.normal(kb, (DIM,), dtype=jnp.float32),
    }

    out = attention_forward(x, params, heads=HEADS, dim_head=DIM_HEAD,
                            knn_attention=0.7)
    out = jax.block_until_ready(out)
    assert out.shape == (B, N, DIM) and bool(jnp.isfinite(out).all())
    print("KERNEL_OK")
</pallas_src>

<mosaic_0001>
module attributes {stable_mosaic.version = 11 : i64} {
  func.func @_matmul_kernel(%arg0: i32, %arg1: i32, %arg2: i32, %arg3: memref<16x32xf32, #tpu.memory_space<vmem>>, %arg4: memref<32x192xf32, #tpu.memory_space<vmem>>, %arg5: memref<16x192xf32, #tpu.memory_space<vmem>>, %arg6: memref<16x192xf32, #tpu.memory_space<vmem>>) attributes {dimension_semantics = [#tpu.dimension_semantics<parallel>, #tpu.dimension_semantics<parallel>, #tpu.dimension_semantics<arbitrary>], iteration_bounds = array<i64: 1, 1, 1>, scalar_prefetch = 0 : i64, scratch_operands = 1 : i64, tpu.core_type = #tpu.core_type<tc>, window_params = [{transform_indices = @transform_0, window_bounds = array<i64: 16, 32>}, {transform_indices = @transform_1, window_bounds = array<i64: 32, 192>}, {transform_indices = @transform_2, window_bounds = array<i64: 16, 192>}]} {
    %c0_i32 = arith.constant 0 : i32
    %0 = arith.cmpi eq, %arg2, %c0_i32 : i32
    %1 = arith.extui %0 : i1 to i32
    %c0_i32_0 = arith.constant 0 : i32
    %2 = arith.cmpi ne, %1, %c0_i32_0 : i32
    scf.if %2 {
      %cst_10 = arith.constant 0.000000e+00 : f32
      %12 = vector.broadcast %cst_10 : f32 to vector<16x192xf32>
      %c0_11 = arith.constant 0 : index
      %c0_12 = arith.constant 0 : index
      %13 = vector.load %arg6[%c0_11, %c0_12] : memref<16x192xf32, #tpu.memory_space<vmem>>, vector<16x192xf32>
      tpu.vector_store %arg6[%c0_11, %c0_12], %12 {strides = array<i32>} : memref<16x192xf32, #tpu.memory_space<vmem>>, vector<16x192xf32>,
    } else {
    }
    %c0 = arith.constant 0 : index
    %c0_1 = arith.constant 0 : index
    %3 = vector.load %arg6[%c0, %c0_1] : memref<16x192xf32, #tpu.memory_space<vmem>>, vector<16x192xf32>
    %c0_2 = arith.constant 0 : index
    %c0_3 = arith.constant 0 : index
    %4 = vector.load %arg3[%c0_2, %c0_3] : memref<16x32xf32, #tpu.memory_space<vmem>>, vector<16x32xf32>
    %c0_4 = arith.constant 0 : index
    %c0_5 = arith.constant 0 : index
    %5 = vector.load %arg4[%c0_4, %c0_5] : memref<32x192xf32, #tpu.memory_space<vmem>>, vector<32x192xf32>
    %cst = arith.constant dense<0.000000e+00> : vector<16x192xf32>
    %6 = tpu.matmul %4, %5, %cst {dimension_numbers = #tpu.dot_dimension_numbers<[1], [0], [0], [1], [0, 0, 1, 1], [], []>} : vector<16x32xf32>, vector<32x192xf32>, vector<16x192xf32> -> vector<16x192xf32>
    %7 = arith.addf %3, %6 : vector<16x192xf32>
    %c0_6 = arith.constant 0 : index
    %c0_7 = arith.constant 0 : index
    %8 = vector.load %arg6[%c0_6, %c0_7] : memref<16x192xf32, #tpu.memory_space<vmem>>, vector<16x192xf32>
    tpu.vector_store %arg6[%c0_6, %c0_7], %7 {strides = array<i32>} : memref<16x192xf32, #tpu.memory_space<vmem>>, vector<16x192xf32>,
    %c0_i32_8 = arith.constant 0 : i32
    %9 = arith.cmpi eq, %arg2, %c0_i32_8 : i32
    %10 = arith.extui %9 : i1 to i32
    %c0_i32_9 = arith.constant 0 : i32
    %11 = arith.cmpi ne, %10, %c0_i32_9 : i32
    scf.if %11 {
      %c0_10 = arith.constant 0 : index
      %c0_11 = arith.constant 0 : index
      %12 = vector.load %arg6[%c0_10, %c0_11] : memref<16x192xf32, #tpu.memory_space<vmem>>, vector<16x192xf32>
      %c0_12 = arith.constant 0 : index
      %c0_13 = arith.constant 0 : index
      %13 = vector.load %arg5[%c0_12, %c0_13] : memref<16x192xf32, #tpu.memory_space<vmem>>, vector<16x192xf32>
      tpu.vector_store %arg5[%c0_12, %c0_13], %12 {strides = array<i32>} : memref<16x192xf32, #tpu.memory_space<vmem>>, vector<16x192xf32>,
    } else {
    }
    return
  }
  func.func @transform_0(%arg0: i32, %arg1: i32, %arg2: i32) -> (i32, i32) {
    %c0_i32 = arith.constant 0 : i32
    return %arg0, %arg2 : i32, i32
  }
  func.func @transform_1(%arg0: i32, %arg1: i32, %arg2: i32) -> (i32, i32) {
    %c0_i32 = arith.constant 0 : i32
    return %arg2, %arg1 : i32, i32
  }
  func.func @transform_2(%arg0: i32, %arg1: i32, %arg2: i32) -> (i32, i32) {
    %c0_i32 = arith.constant 0 : i32
    return %arg0, %arg1 : i32, i32
  }
}

</mosaic_0001>

<bundles_post_ra>
// kernel: tpu_custom_call.1
= control target key start
LH: loop header
LB: loop body
LE: loop exit
PB: predicated region body
PF: predicated region fallthrough
CT: control target
= control target key end

     0   :  { %7 = vsyncpa [#allocation4], 0  ;;  %s313_s0 = inlined_call_operand.hbm [shape: f32[16,32], index: 0, kind: input, shape index: {}]   ;;  %s314_s1 = inlined_call_operand.hbm [shape: f32[32,192], index: 1, kind: input, shape index: {}]   ;;  %s315_s2 = inlined_call_operand.hbm [shape: f32[16,192], index: 2, kind: output, shape index: {}]  }
   0x1   :  { %8 = vsyncpa [#allocation7], 0 }
   0x2   :  { %9 = vsyncpa [#allocation5], 0  ;;  %s269_s9 = smov [#allocation3]  }
   0x3   :  { %s15_s10 = sshll.u32 %s269_s9, 4  ;;  %s16_s10 = int_to_ptr.vmem [resolvable:$true] %s15_s10 }
   0x4   :  { %s211_s11 = scalar_lea.vmem %s16_s10, 256  ;;  %p216_p1 = scmp.lt.s32.totalorder %s16_s10, %s16_s10 }
   0x5   :  { %p212_p0 = scmp.ne.s32.totalorder %s16_s10, %s211_s11  ;;  %p217_p2 = scmp.lt.s32.totalorder %s211_s11, %s211_s11 }
   0x7   :  { %p218_p3 = por %p217_p2, %p216_p1 }
   0x9   :  { %p219_p4 = pnand %p218_p3, %p212_p0 }
   0xb   :  { %222 = shalt.err (!%p219_p4)
}
   0xc   :  { %s270_s12 = smov 128   ;;  %s271_s13 = smov 8  }
   0xd   :  { %21 = dma.hbm_to_vmem [thread:$0]  %s313_s0, 256, %s16_s10, [#allocation4], %s270_s12, %s270_s12, %s271_s13  }
   0xe   :  { %s272_s16 = smov [#allocation6]  }
   0xf   :  { %s27_s17 = sshll.u32 %s272_s16, 4  ;;  %s28_s17 = int_to_ptr.vmem [resolvable:$true] %s27_s17 }
  0x10   :  { %s231_s18 = scalar_lea.vmem %s28_s17, 1024  ;;  %p236_p6 = scmp.lt.s32.totalorder %s28_s17, %s28_s17 }
  0x11   :  { %p232_p5 = scmp.ne.s32.totalorder %s28_s17, %s231_s18  ;;  %p237_p7 = scmp.lt.s32.totalorder %s231_s18, %s231_s18 }
  0x13   :  { %p238_p8 = por %p237_p7, %p236_p6 }
  0x15   :  { %p239_p9 = pnand %p238_p8, %p232_p5 }
  0x17   :  { %242 = shalt.err (!%p239_p9)
}
  0x18   :  { %s273_s19 = smov 256   ;;  %s274_s20 = smov 16  }
  0x19   :  { %33 = dma.hbm_to_vmem [thread:$0]  %s314_s1, 1024, %s28_s17, [#allocation7], %s273_s19, %s273_s19, %s274_s20  }
  0x1a   :  { %263 = dma.done.wait [#allocation4], 256  }
  0x1b   :  { %264 = vsyncadd [#allocation4], 4294967040 }
  0x1c   :  { %265 = dma.done.wait [#allocation7], 1024  }
  0x1d   :  { %266 = vsyncadd [#allocation7], 4294966272  ;;  %v275_v0 = vmov 0.0   ;;  %v62_v1 = vld [vmem:[#allocation6 + $0x38] sm:$0xff]  ;;  %v61_v2 = vld [vmem:[#allocation6 + $0x30] sm:$0xff]  ;;  %vm63_vm0 = vcmask 261120  }
  0x1e   :  { %134 = vmatprep.mubr.f32.mxu0 %v275_v0  ;;  %140 = vmatprep.mubr.f32.mxu1 %v275_v0  ;;  %v60_v3 = vld [vmem:[#allocation6 + $0x28] sm:$0xff]  ;;  %v59_v4 = vld [vmem:[#allocation6 + $0x20] sm:$0xff]  ;;  %v58_v5 = vld [vmem:[#allocation6 + $0x18] sm:$0xff]  ;;  %vm45_vm1 = vcmask 523264   ;;  %s276_s0 = smov [#allocation8]  }
  0x1f   :  { %94 = vmatprep.subr.mxu0 %v62_v1  ;;  %187 = vmatprep.subr.mxu1 %v62_v1  ;;  %v57_v6 = vld [vmem:[#allocation6 + $0x10] sm:$0xff]  ;;  %v56_v7 = vld [vmem:[#allocation6 + $0x8] sm:$0xff]  ;;  %v55_v8 = vld [vmem:[#allocation6] sm:$0xff]  ;;  %46 = vst.msk [vmem:[#allocation2 + $0x8] sm:$0xff] %vm45_vm1, %v275_v0  ;;  %s172_s1 = sshll.u32 %s276_s0, 4  ;;  %s173_s1 = int_to_ptr.vmem [resolvable:$true] %s172_s1 }
  0x20   :  { %95 = vmatpush1.msra.mxu0 %v61_v2  ;;  %191 = vmatpush1.msra.mxu1 %v61_v2  ;;  %v53_v9 = vld [vmem:[#allocation3] sm:$0xff]  ;;  %v54_v10 = vld [vmem:[#allocation3 + $0x8] sm:$0xff]  ;;  %48 = vst.msk [vmem:[#allocation2 + $0x18] sm:$0xff] %vm45_vm1, %v275_v0  ;;  %s243_s23 = scalar_lea.vmem %s173_s1, 512  ;;  %p248_p11 = scmp.lt.s32.totalorder %s173_s1, %s173_s1 }
  0x21   :  { %96 = vmatprep.subr.mxu0 %v60_v3  ;;  %188 = vmatprep.subr.mxu1 %v60_v3  ;;  %p244_p10 = scmp.ne.s32.totalorder %s173_s1, %s243_s23  ;;  %p249_p12 = scmp.lt.s32.totalorder %s243_s23, %s243_s23 }
  0x22   :  { %97 = vmatpush1.msra.mxu0 %v59_v4  ;;  %192 = vmatpush1.msra.mxu1 %v59_v4 }
  0x23   :  { %98 = vmatprep.subr.mxu0 %v58_v5  ;;  %189 = vmatprep.subr.mxu1 %v58_v5  ;;  %p250_p13 = por %p249_p12, %p248_p11 }
  0x24   :  { %99 = vmatpush1.msra.mxu0 %v57_v6  ;;  %193 = vmatpush1.msra.mxu1 %v57_v6 }
  0x25   :  { %100 = vmatprep.subr.mxu0 %v56_v7  ;;  %190 = vmatprep.subr.mxu1 %v56_v7  ;;  %p251_p0 = pnand %p250_p13, %p244_p10 }
  0x26   :  { %101 = vmatpush1.msra.mxu0 %v55_v8  ;;  %194 = vmatpush1.msra.mxu1 %v55_v8  ;;  %v50_v13 = vld [vmem:[#allocation2 + $0x8] sm:$0xff] }
  0x27   :  { %185 = vmatmul.mubr.msk.f32.vlgmr.msra.gmra.mxu0 %vm63_vm0, %v53_v9  ;;  %186 = vmatmul.mubr.msk.f32.vlgmr.msra.gmra.mxu1 %vm63_vm0, %v54_v10  ;;  %v52_v14 = vld [vmem:[#allocation2 + $0x18] sm:$0xff] }
  0xe7   :  { %v136_v11 = vpop.f32.mrf.mxu0  ;;  %v142_v12 = vpop.f32.mrf.mxu1 }
  0xe8   :  { %163 = vst [vmem:[#allocation8] sm:$0xff] %v136_v11  ;;  %165 = vst [vmem:[#allocation8 + $0x10] sm:$0xff] %v142_v12 }
  0xe9   :  { %v138_v15 = vpop.f32.mrf.mxu0  ;;  %v144_v16 = vpop.f32.mrf.mxu1 }
  0xea   :  { %v148_v17 = vadd.f32 %v138_v15, %v50_v13  ;;  %v150_v18 = vadd.f32 %v144_v16, %v52_v14 }
  0xec   :  { %153 = vst.msk [vmem:[#allocation2 + $0x8] sm:$0xff] %vm45_vm1, %v148_v17  ;;  %155 = vst.msk [vmem:[#allocation2 + $0x18] sm:$0xff] %vm45_vm1, %v150_v18 }
  0xf3   :  { %v160_v19 = vld [vmem:[#allocation2 + $0x8] sm:$0xff]  ;;  %v162_v20 = vld [vmem:[#allocation2 + $0x18] sm:$0xff] }
  0xf4   :  { %164 = vst.msk [vmem:[#allocation8 + $0x8] sm:$0xff] %vm45_vm1, %v160_v19  ;;  %166 = vst.msk [vmem:[#allocation8 + $0x18] sm:$0xff] %vm45_vm1, %v162_v20 }
  0xf5   :  { %254 = shalt.err (!%p251_p0)
}
  0xf6   :  { %178 = dma.vmem_to_hbm [thread:$0]  %s173_s1, 512, %s315_s2, [#allocation5], %s273_s19, %s273_s19, %s274_s20  }
  0xf7   :  { %267 = dma.done.wait [#allocation5], 512  }
  0xf8   :  { %268 = vsyncadd [#allocation5], 4294966784 }
  0xf9   :  { %182 = vsyncpa [#allocation4], 1 }
  0xfa   :  { %183 = vsyncpa [#allocation7], 1 }
  0xfb   :  { %184 = vsyncpa [#allocation5], 1 }

</bundles_post_ra>
